<compile_context>
chip_gen: v6e
topology: v6e:2x2x1
jax: 0.10.0
libtpu: 0.0.40
codegen_flags: <defaults>
</compile_context>

<pallas_src>
import functools

import jax
import jax.numpy as jnp
from jax.experimental import pallas as pl
from jax.experimental.pallas import tpu as pltpu

IN_FEATURES = 512
NUM_CLASSES = 10
PAD_CLASSES = 128          # lane-aligned weight slab for the MXU
TB_DEFAULT = 2048          # max batch tile (rows)


def _round_up(x, m):
    return ((x + m - 1) // m) * m


def _choose_tb(batch, tb_default):
    """Batch tile: multiple of 8 sublanes, >=2 grid steps when possible (v7x)."""
    half = _round_up(max(1, -(-batch // 2)), 8)
    return max(8, min(tb_default, half))


# ---------------------------------------------------------------------------
# Kernels
# ---------------------------------------------------------------------------

def _fc_fwd_kernel(x_ref, w_ref, b_ref, o_ref):
    # x_ref: (TB, 512) native dtype, w_ref: (512, 128) bf16, b_ref: (1, 128) f32,
    # o_ref: (TB, 10) f32.  Cast on the VPU (hides under the x DMA), one MXU
    # matmul with f32 accumulation, bias add, narrow masked store.
    xb = x_ref[...].astype(jnp.bfloat16)
    acc = jnp.dot(xb, w_ref[...], preferred_element_type=jnp.float32)
    logits = acc + b_ref[...]
    o_ref[...] = logits[:, :NUM_CLASSES]


def _fc_predict_kernel(x_ref, w_ref, b_ref, o_ref):
    # Same matmul as the forward kernel, then an in-kernel argmax over the 10
    # valid class lanes (padded lanes masked to -inf).  o_ref: (TB, 1) int32.
    xb = x_ref[...].astype(jnp.bfloat16)
    acc = jnp.dot(xb, w_ref[...], preferred_element_type=jnp.float32)
    logits = acc + b_ref[...]
    lane = jax.lax.broadcasted_iota(jnp.int32, logits.shape, 1)
    masked = jnp.where(lane < NUM_CLASSES, logits, -jnp.inf)
    row_max = jnp.max(masked, axis=-1, keepdims=True)
    # Manual argmax (max + where + min) keeps the lowering to plain VPU/XLU ops;
    # ties resolve to the smallest index, matching torch.argmax/jnp.argmax.
    idx = jnp.min(jnp.where(masked == row_max, lane, PAD_CLASSES),
                  axis=-1, keepdims=True)
    o_ref[...] = idx.astype(jnp.int32)


# ---------------------------------------------------------------------------
# Wrappers
# ---------------------------------------------------------------------------

def pack_fc_params(w, b):
    """One-time packing of nn.Linear(512, 10) params for the kernel.

    w: (10, 512) f32 (PyTorch layout), b: (10,) f32
    returns: w_packed (512, 128) bf16, b_packed (1, 128) f32 (zero-padded lanes)
    """
    w_t = jnp.transpose(w).astype(jnp.bfloat16)                     # (512, 10)
    w_packed = jnp.zeros((IN_FEATURES, PAD_CLASSES), jnp.bfloat16)
    w_packed = w_packed.at[:, :NUM_CLASSES].set(w_t)
    b_packed = jnp.zeros((1, PAD_CLASSES), jnp.float32)
    b_packed = b_packed.at[0, :NUM_CLASSES].set(b.astype(jnp.float32))
    return w_packed, b_packed


def _run_head(kernel, x, w_packed, b_packed, out_dtype, out_cols, tb):
    batch = x.shape[0]
    tb = _choose_tb(batch, tb)
    grid = (pl.cdiv(batch, tb),)

    bytes_accessed = (batch * IN_FEATURES * x.dtype.itemsize       # x (native)
                      + IN_FEATURES * PAD_CLASSES * 2              # w (bf16)
                      + PAD_CLASSES * 4                            # bias (f32)
                      + batch * out_cols * jnp.dtype(out_dtype).itemsize)
    cost = pl.CostEstimate(
        flops=2 * batch * IN_FEATURES * PAD_CLASSES,
        transcendentals=0,
        bytes_accessed=bytes_accessed,
    )

    return pl.pallas_call(
        kernel,
        out_shape=jax.ShapeDtypeStruct((batch, out_cols), out_dtype),
        grid_spec=pl.GridSpec(
            grid=grid,
            in_specs=[
                pl.BlockSpec((tb, IN_FEATURES), lambda i: (i, 0)),
                pl.BlockSpec((IN_FEATURES, PAD_CLASSES), lambda i: (0, 0)),
                pl.BlockSpec((1, PAD_CLASSES), lambda i: (0, 0)),
            ],
            out_specs=pl.BlockSpec((tb, out_cols), lambda i: (i, 0)),
        ),
        compiler_params=pltpu.CompilerParams(
            dimension_semantics=("parallel",)),
        cost_estimate=cost,
    )(x, w_packed, b_packed)


@functools.partial(jax.jit, static_argnames=("tb",))
def adv_network_forward(x, w_packed, b_packed, *, tb=TB_DEFAULT):
    """Equivalent of AdvNetwork.forward on already-flattened features.

    x:        (B, 512) features (output of flatten(base_model(X), 1)), any float dtype
    w_packed: (512, 128) bf16  — from pack_fc_params
    b_packed: (1, 128)   f32   — from pack_fc_params
    returns logits: (B, 10) float32
    """
    return _run_head(_fc_fwd_kernel, x, w_packed, b_packed,
                     jnp.float32, NUM_CLASSES, tb)


@functools.partial(jax.jit, static_argnames=("tb",))
def adv_network_predict(x, w_packed, b_packed, *, tb=TB_DEFAULT):
    """Equivalent of AdvNetwork.predict: fused matmul + argmax (no logits writeback)."""
    idx = _run_head(_fc_predict_kernel, x, w_packed, b_packed,
                    jnp.int32, 1, tb)
    return idx[:, 0]


def init_params(key):
    """Deterministic init mirroring nn.Linear(512, 10) default init
    (uniform(-1/sqrt(fan_in), 1/sqrt(fan_in)))."""
    k_w, k_b = jax.random.split(key)
    bound = 1.0 / jnp.sqrt(jnp.float32(IN_FEATURES))
    w = jax.random.uniform(k_w, (NUM_CLASSES, IN_FEATURES), jnp.float32,
                           minval=-bound, maxval=bound)
    b = jax.random.uniform(k_b, (NUM_CLASSES,), jnp.float32,
                           minval=-bound, maxval=bound)
    return w, b


if __name__ == "__main__":
    key = jax.random.PRNGKey(0)
    k_x, k_p = jax.random.split(key)

    w, b = init_params(k_p)
    # One-time weight packing (transpose + pad + bf16 cast), hoisted out of the
    # per-call path.
    w_packed, b_packed = pack_fc_params(w, b)

    # B=8: aligned batch; B=13: exercises the ragged last grid block (no pad pass).
    for B in (8, 13):
        kx = jax.random.fold_in(k_x, B)
        # x stands in for flatten(base_model(X), 1) -> (B, 512) features
        x = jax.random.normal(kx, (B, IN_FEATURES), jnp.float32)

        logits = jax.block_until_ready(adv_network_forward(x, w_packed, b_packed))
        assert logits.shape == (B, NUM_CLASSES)

        # Reference with matching bf16 rounding of x and w (kernel casts both to
        # bf16 for the MXU, accumulates in f32).
        x_bf = x.astype(jnp.bfloat16).astype(jnp.float32)
        w_bf = w.astype(jnp.bfloat16).astype(jnp.float32)
        ref_bf = x_bf @ w_bf.T + b
        assert jnp.allclose(logits, ref_bf, atol=1e-3, rtol=1e-3)

        # Looser check against the full-f32 reference (bf16 rounding tolerance).
        ref_f32 = x @ w.T + b
        assert jnp.allclose(logits, ref_f32, atol=5e-2, rtol=5e-2)

        preds = jax.block_until_ready(adv_network_predict(x, w_packed, b_packed))
        assert preds.shape == (B,)
        assert jnp.array_equal(preds, jnp.argmax(logits, axis=1))

    print("KERNEL_OK")
</pallas_src>

<mosaic_0001>
module attributes {stable_mosaic.version = 11 : i64} {
  func.func @_fc_fwd_kernel(%arg0: i32, %arg1: memref<8x512xf32, #tpu.memory_space<vmem>>, %arg2: memref<512x128xbf16, #tpu.memory_space<vmem>>, %arg3: memref<1x128xf32, #tpu.memory_space<vmem>>, %arg4: memref<8x10xf32, #tpu.memory_space<vmem>>) attributes {dimension_semantics = [#tpu.dimension_semantics<parallel>], iteration_bounds = array<i64: 1>, scalar_prefetch = 0 : i64, scratch_operands = 0 : i64, tpu.core_type = #tpu.core_type<tc>, window_params = [{transform_indices = @transform_0, window_bounds = array<i64: 8, 512>}, {pipeline_mode = #tpu.pipeline_mode<synchronous>, transform_indices = @transform_1, window_bounds = array<i64: 512, 128>}, {pipeline_mode = #tpu.pipeline_mode<synchronous>, transform_indices = @transform_2, window_bounds = array<i64: 1, 128>}, {transform_indices = @transform_3, window_bounds = array<i64: 8, 10>}]} {
    %c0 = arith.constant 0 : index
    %c0_0 = arith.constant 0 : index
    %0 = vector.load %arg1[%c0, %c0_0] : memref<8x512xf32, #tpu.memory_space<vmem>>, vector<8x512xf32>
    %1 = arith.truncf %0 : vector<8x512xf32> to vector<8x512xbf16>
    %c0_1 = arith.constant 0 : index
    %c0_2 = arith.constant 0 : index
    %2 = vector.load %arg2[%c0_1, %c0_2] : memref<512x128xbf16, #tpu.memory_space<vmem>>, vector<512x128xbf16>
    %cst = arith.constant dense<0.000000e+00> : vector<8x128xf32>
    %3 = tpu.matmul %1, %2, %cst {dimension_numbers = #tpu.dot_dimension_numbers<[1], [0], [0], [1], [0, 0, 1, 1], [], []>} : vector<8x512xbf16>, vector<512x128xbf16>, vector<8x128xf32> -> vector<8x128xf32>
    %c0_3 = arith.constant 0 : index
    %c0_4 = arith.constant 0 : index
    %4 = vector.load %arg3[%c0_3, %c0_4] : memref<1x128xf32, #tpu.memory_space<vmem>>, vector<1x128xf32>
    %5 = vector.broadcast %4 : vector<1x128xf32> to vector<8x128xf32>
    %6 = arith.addf %3, %5 : vector<8x128xf32>
    %7 = vector.extract_strided_slice %6 {offsets = [0, 0], sizes = [8, 10], strides = [1, 1]} : vector<8x128xf32> to vector<8x10xf32>
    %c0_5 = arith.constant 0 : index
    %c0_6 = arith.constant 0 : index
    %8 = vector.load %arg4[%c0_5, %c0_6] : memref<8x10xf32, #tpu.memory_space<vmem>>, vector<8x10xf32>
    tpu.vector_store %arg4[%c0_5, %c0_6], %7 {strides = array<i32>} : memref<8x10xf32, #tpu.memory_space<vmem>>, vector<8x10xf32>,
    return
  }
  func.func @transform_0(%arg0: i32) -> (i32, i32) {
    %c0_i32 = arith.constant 0 : i32
    %c0_i32_0 = arith.constant 0 : i32
    return %arg0, %c0_i32 : i32, i32
  }
  func.func @transform_1(%arg0: i32) -> (i32, i32) {
    %c0_i32 = arith.constant 0 : i32
    %c0_i32_0 = arith.constant 0 : i32
    %c0_i32_1 = arith.constant 0 : i32
    return %c0_i32, %c0_i32_0 : i32, i32
  }
  func.func @transform_2(%arg0: i32) -> (i32, i32) {
    %c0_i32 = arith.constant 0 : i32
    %c0_i32_0 = arith.constant 0 : i32
    %c0_i32_1 = arith.constant 0 : i32
    return %c0_i32, %c0_i32_0 : i32, i32
  }
  func.func @transform_3(%arg0: i32) -> (i32, i32) {
    %c0_i32 = arith.constant 0 : i32
    %c0_i32_0 = arith.constant 0 : i32
    return %arg0, %c0_i32 : i32, i32
  }
}

</mosaic_0001>

<bundles_post_ra>
// kernel: adv_network_forward.1
= control target key start
LH: loop header
LB: loop body
LE: loop exit
PB: predicated region body
PF: predicated region fallthrough
CT: control target
= control target key end

     0   :  { %8 = vsyncpa [#allocation3], 0  ;;  %s628_s0 = inlined_call_operand.hbm [shape: f32[8,512], index: 0, kind: input, shape index: {}]   ;;  %s629_s1 = inlined_call_operand.hbm [shape: bf16[512,128], index: 1, kind: input, shape index: {}]   ;;  %s630_s2 = inlined_call_operand.vmem [shape: f32[1,128], index: 2, kind: input, shape index: {}]   ;;  %s631_s3 = inlined_call_operand.hbm [shape: f32[8,10], index: 3, kind: output, shape index: {}]  }
   0x1   :  { %9 = vsyncpa [#allocation6], 0 }
   0x2   :  { %10 = vsyncpa [#allocation4], 0  ;;  %s591_s12 = smov [#allocation2]   ;;  %s592_s14 = smov [#allocation5]  }
   0x3   :  { %s17_s13 = sshll.u32 %s591_s12, 4  ;;  %s26_s15 = sshll.u32 %s592_s14, 4  ;;  %s18_s13 = int_to_ptr.vmem [resolvable:$true] %s17_s13  ;;  %s27_s15 = int_to_ptr.vmem [resolvable:$true] %s26_s15 }
   0x4   :  { %s533_s16 = scalar_lea.vmem %s18_s13, 512  ;;  %p538_p1 = scmp.lt.s32.totalorder %s18_s13, %s18_s13 }
   0x5   :  { %p534_p0 = scmp.ne.s32.totalorder %s18_s13, %s533_s16  ;;  %p539_p2 = scmp.lt.s32.totalorder %s533_s16, %s533_s16 }
   0x7   :  { %p540_p3 = por %p539_p2, %p538_p1 }
   0x9   :  { %p541_p4 = pnand %p540_p3, %p534_p0 }
   0xb   :  { %544 = shalt.err (!%p541_p4)
}
   0xc   :  { %20 = dma.hbm_to_vmem [thread:$0]  %s628_s0, 512, %s18_s13, [#allocation3]  }
   0xd   :  { %s553_s19 = scalar_lea.vmem %s27_s15, 4096  ;;  %p558_p6 = scmp.lt.s32.totalorder %s27_s15, %s27_s15 }
   0xe   :  { %p554_p5 = scmp.ne.s32.totalorder %s27_s15, %s553_s19  ;;  %p559_p7 = scmp.lt.s32.totalorder %s553_s19, %s553_s19 }
  0x10   :  { %p560_p8 = por %p559_p7, %p558_p6 }
  0x12   :  { %p561_p9 = pnand %p560_p8, %p554_p5 }
  0x14   :  { %564 = shalt.err (!%p561_p9)
}
  0x15   :  { %s593_s20 = smov 64   ;;  %s594_s21 = smov 4  }
  0x16   :  { %32 = dma.hbm_to_vmem [thread:$0]  %s629_s1, 4096, %s27_s15, [#allocation6], %s593_s20, %s593_s20, %s594_s21  }
  0x17   :  { %585 = dma.done.wait [#allocation3], 512  }
  0x18   :  { %586 = vsyncadd [#allocation3], 4294966784 }
  0x19   :  { %587 = dma.done.wait [#allocation6], 4096  }
  0x1a   :  { %588 = vsyncadd [#allocation6], 4294963200  ;;  %v493_v0 = vld [vmem:[#allocation5 + $0x78] sm:$0xff]   ;;  %v497_v4 = vld [vmem:[#allocation5 + $0x70] sm:$0xff]   ;;  %s595_s24 = smov [#allocation7]   ;;  %vm393_vm0 = vcmask 80896  }
  0x1b   :  { %v494_v1 = vld [vmem:[#allocation5 + $0xf8] sm:$0xff]   ;;  %444 = vmatprep.subr.bf16.mxu0 %v493_v0  ;;  %v498_v5 = vld [vmem:[#allocation5 + $0xf0] sm:$0xff]   ;;  %v501_v8 = vld [vmem:[#allocation5 + $0x68] sm:$0xff]   ;;  %s401_s25 = sshll.u32 %s595_s24, 4  ;;  %s402_s25 = int_to_ptr.vmem [resolvable:$true] %s401_s25 }
  0x1c   :  { %v495_v2 = vld [vmem:[#allocation5 + $0x38] sm:$0xff]   ;;  %466 = vmatprep.subr.bf16.mxu1 %v494_v1  ;;  %v499_v6 = vld [vmem:[#allocation5 + $0x30] sm:$0xff]   ;;  %v502_v9 = vld [vmem:[#allocation5 + $0xe8] sm:$0xff]   ;;  %s565_s26 = scalar_lea.vmem %s402_s25, 128  ;;  %p570_p11 = scmp.lt.s32.totalorder %s402_s25, %s402_s25 }
  0x1d   :  { %v496_v3 = vld [vmem:[#allocation5 + $0xb8] sm:$0xff]   ;;  %445 = vmatpush3.bf16.msra.mxu0 %v495_v2  ;;  %v500_v7 = vld [vmem:[#allocation5 + $0xb0] sm:$0xff]   ;;  %v503_v10 = vld [vmem:[#allocation5 + $0x28] sm:$0xff]   ;;  %p566_p10 = scmp.ne.s32.totalorder %s402_s25, %s565_s26  ;;  %p571_p12 = scmp.lt.s32.totalorder %s565_s26, %s565_s26 }
  0x1e   :  { %467 = vmatpush3.bf16.msra.mxu1 %v496_v3  ;;  %446 = vmatprep.subr.bf16.mxu0 %v497_v4  ;;  %v504_v11 = vld [vmem:[#allocation5 + $0xa8] sm:$0xff]   ;;  %v505_v12 = vld [vmem:[#allocation5 + $0x60] sm:$0xff]   ;;  %v509_v16 = vld [vmem:[#allocation5 + $0x58] sm:$0xff]  }
  0x1f   :  { %468 = vmatprep.subr.bf16.mxu1 %v498_v5  ;;  %v506_v13 = vld [vmem:[#allocation5 + $0xe0] sm:$0xff]   ;;  %v510_v17 = vld [vmem:[#allocation5 + $0xd8] sm:$0xff]   ;;  %v513_v20 = vld [vmem:[#allocation5 + $0x50] sm:$0xff]   ;;  %p572_p13 = por %p571_p12, %p570_p11 }
  0x20   :  { %v507_v14 = vld [vmem:[#allocation5 + $0x20] sm:$0xff]   ;;  %v511_v18 = vld [vmem:[#allocation5 + $0x18] sm:$0xff]   ;;  %v514_v21 = vld [vmem:[#allocation5 + $0xd0] sm:$0xff]  }
  0x21   :  { %447 = vmatpush3.bf16.msra.mxu0 %v499_v6  ;;  %v508_v15 = vld [vmem:[#allocation5 + $0xa0] sm:$0xff]   ;;  %v512_v19 = vld [vmem:[#allocation5 + $0x98] sm:$0xff]   ;;  %v515_v22 = vld [vmem:[#allocation5 + $0x10] sm:$0xff]   ;;  %p573_p0 = pnand %p572_p13, %p566_p10 }
  0x22   :  { %469 = vmatpush3.bf16.msra.mxu1 %v500_v7  ;;  %448 = vmatprep.subr.bf16.mxu0 %v501_v8  ;;  %v516_v23 = vld [vmem:[#allocation5 + $0x90] sm:$0xff]   ;;  %v517_v24 = vld [vmem:[#allocation5 + $0x48] sm:$0xff]   ;;  %v521_v28 = vld [vmem:[#allocation5 + $0x40] sm:$0xff]  }
  0x23   :  { %470 = vmatprep.subr.bf16.mxu1 %v502_v9  ;;  %v518_v25 = vld [vmem:[#allocation5 + $0xc8] sm:$0xff]   ;;  %v522_v29 = vld [vmem:[#allocation5 + $0xc0] sm:$0xff]   ;;  %v45_v33 = vld [vmem:[#allocation2 + $0x18] sm:$0xff] }
  0x24   :  { %v519_v26 = vld [vmem:[#allocation5 + $0x8] sm:$0xff]   ;;  %v523_v30 = vld [vmem:[#allocation5] sm:$0xff]   ;;  %v49_v36 = vpack.c.bf16 %v45_v33, %v45_v33  ;;  %v44_v38 = vld [vmem:[#allocation2 + $0x10] sm:$0xff] }
  0x25   :  { %449 = vmatpush3.bf16.msra.mxu0 %v503_v10  ;;  %v520_v27 = vld [vmem:[#allocation5 + $0x88] sm:$0xff]   ;;  %v524_v31 = vld [vmem:[#allocation5 + $0x80] sm:$0xff]   ;;  %v48_v39 = vpack.c.bf16 %v44_v38, %v44_v38 }
  0x26   :  { %471 = vmatpush3.bf16.msra.mxu1 %v504_v11  ;;  %450 = vmatprep.subr.bf16.mxu0 %v505_v12  ;;  %v43_v32 = vld [vmem:[#allocation2 + $0x8] sm:$0xff]  ;;  %v42_v34 = vld [vmem:[#allocation2] sm:$0xff] }
  0x27   :  { %472 = vmatprep.subr.bf16.mxu1 %v506_v13  ;;  %v47_v35 = vpack.c.bf16 %v43_v32, %v43_v32  ;;  %v46_v37 = vpack.c.bf16 %v42_v34, %v42_v34  ;;  %385 = vmatprep.mubr.bf16.mxu1 %v49_v36  ;;  %v411_v42 = vld [vmem:[%s630_s2] ss:$0 sm:$0xff] }
  0x29   :  { %451 = vmatpush3.bf16.msra.mxu0 %v507_v14  ;;  %345 = vmatprep.mubr.bf16.mxu0 %v47_v35 }
  0x2a   :  { %473 = vmatpush3.bf16.msra.mxu1 %v508_v15  ;;  %452 = vmatprep.subr.bf16.mxu0 %v509_v16 }
  0x2b   :  { %474 = vmatprep.subr.bf16.mxu1 %v510_v17 }
  0x2d   :  { %453 = vmatpush3.bf16.msra.mxu0 %v511_v18 }
  0x2e   :  { %475 = vmatpush3.bf16.msra.mxu1 %v512_v19  ;;  %454 = vmatprep.subr.bf16.mxu0 %v513_v20 }
  0x2f   :  { %476 = vmatprep.subr.bf16.mxu1 %v514_v21 }
  0x31   :  { %455 = vmatpush3.bf16.msra.mxu0 %v515_v22 }
  0x32   :  { %477 = vmatpush3.bf16.msra.mxu1 %v516_v23  ;;  %456 = vmatprep.subr.bf16.mxu0 %v517_v24 }
  0x33   :  { %478 = vmatprep.subr.bf16.mxu1 %v518_v25 }
  0x35   :  { %457 = vmatpush3.bf16.msra.mxu0 %v519_v26 }
  0x36   :  { %479 = vmatpush3.bf16.msra.mxu1 %v520_v27  ;;  %458 = vmatprep.subr.bf16.mxu0 %v521_v28 }
  0x37   :  { %480 = vmatprep.subr.bf16.mxu1 %v522_v29 }
  0x39   :  { %459 = vmatpush3.bf16.msra.mxu0 %v523_v30 }
  0x3a   :  { %481 = vmatpush3.bf16.msra.mxu1 %v524_v31 }
  0x3c   :  { %346 = vmatmul.mubr.bf16.vlgmr.msra.gmra.mxu0 %v46_v37 }
  0x3d   :  { %386 = vmatmul.mubr.bf16.vlgmr.msra.gmra.mxu1 %v48_v39 }
  0xfc   :  { %v460_v40 = vpop.f32.mrf.mxu0 }
  0xfd   :  { %v482_v41 = vpop.f32.mrf.mxu1 }
  0xfe   :  { %v461_v43 = vpop.f32.mrf.mxu0 }
  0xff   :  { %v483_v44 = vpop.f32.mrf.mxu1  ;;  %v462_v45 = vadd.f32 %v461_v43, %v460_v40 }
 0x100   :  { %v463_v46 = vpop.f32.mrf.mxu0  ;;  %v484_v49 = vadd.f32 %v483_v44, %v482_v41 }
 0x101   :  { %v485_v47 = vpop.f32.mrf.mxu1  ;;  %v348_v48 = vadd.f32 %v462_v45, %v411_v42 }
 0x102   :  { %v464_v50 = vpop.f32.mrf.mxu0 }
 0x103   :  { %v486_v51 = vpop.f32.mrf.mxu1  ;;  %v388_v52 = vadd.f32 %v484_v49, %v348_v48 }
 0x105   :  { %394 = vst.msk [vmem:[#allocation7] sm:$0xff] %vm393_vm0, %v388_v52 }
 0x106   :  { %576 = shalt.err (!%p573_p0)
}
 0x107   :  { %404 = dma.vmem_to_hbm [thread:$0]  %s402_s25, 128, %s631_s3, [#allocation4]  }
 0x108   :  { %589 = dma.done.wait [#allocation4], 128  }
 0x109   :  { %590 = vsyncadd [#allocation4], 4294967168 }
 0x10a   :  { %408 = vsyncpa [#allocation3], 1 }
 0x10b   :  { %409 = vsyncpa [#allocation6], 1 }
 0x10c   :  { %410 = vsyncpa [#allocation4], 1 }

</bundles_post_ra>
